<compile_context>
chip_gen: v6e
topology: v6e:2x2x1
jax: 0.10.0
libtpu: 0.0.40
codegen_flags: <defaults>
</compile_context>

<pallas_src>
import functools

import numpy as np
import jax
import jax.numpy as jnp
from jax.experimental import pallas as pl
from jax.experimental.pallas import tpu as pltpu


def _round_up(x, m):
    return -(-x // m) * m


# ------------------------------- Pallas kernel -------------------------------
def _tcn_kernel(x_ref, w_ref, b_ref, out_ref, *, levels, clf, c_pad):
    """One batch tile: x (TB, C_in) -> out (TB, C_PAD).

    levels: tuple of (w1_blk, b1_row, w2_blk, b2_row, has_ds, bd_row).
            For has_ds levels the downsample weight block sits immediately
            after the w1 block, so conv1+downsample is one (K, 2*C_PAD) matmul.
    clf:    (wc_blk, bc_row) for the classifier.

    Matmuls take bf16 inputs (f32 accumulation); bias/ReLU/residual are f32.
    """
    h = x_ref[...].astype(jnp.float32)                 # (TB, K0) f32
    for (w1c, b1r, w2c, b2r, has_ds, bdr) in levels:   # statically unrolled
        kdim = h.shape[-1]
        hb = h.astype(jnp.bfloat16)                    # bf16 MXU input
        b1 = b_ref[b1r:b1r + 1, :]
        b2 = b_ref[b2r:b2r + 1, :]
        if has_ds:
            bd = b_ref[bdr:bdr + 1, :]
            # fused [W1 | Wd] matmul: (TB, K) @ (K, 2*C_PAD)
            y = jnp.dot(hb, w_ref[:kdim, w1c * c_pad:(w1c + 2) * c_pad],
                        preferred_element_type=jnp.float32)
            a1 = jnp.maximum(y[:, :c_pad] + b1, 0.0)
            res = y[:, c_pad:] + bd
        else:
            a1 = jnp.maximum(
                jnp.dot(hb, w_ref[:kdim, w1c * c_pad:(w1c + 1) * c_pad],
                        preferred_element_type=jnp.float32) + b1, 0.0)
            res = h
            if res.shape[-1] != c_pad:                 # identity residual, pad lanes
                res = jnp.concatenate(
                    [res, jnp.zeros((res.shape[0], c_pad - res.shape[-1]),
                                    res.dtype)], axis=-1)
        a2 = jnp.maximum(
            jnp.dot(a1.astype(jnp.bfloat16),
                    w_ref[:, w2c * c_pad:(w2c + 1) * c_pad],
                    preferred_element_type=jnp.float32) + b2, 0.0)
        h = jnp.maximum(a2 + res, 0.0)

    wcc, bcr = clf
    out_ref[...] = (jnp.dot(h.astype(jnp.bfloat16),
                            w_ref[:, wcc * c_pad:(wcc + 1) * c_pad],
                            preferred_element_type=jnp.float32)
                    + b_ref[bcr:bcr + 1, :])


def tcn_forward_pallas(x, w_slab, b_slab, levels_meta, clf_meta, num_classes,
                       *, tb_cap=1024):
    """x: (B, C_in) f32.  Returns (B, num_classes) f32."""
    batch, c_in = x.shape
    c_pad = w_slab.shape[0]

    # ---- batch tiling (lane-dense, (8,128)-aligned) ----
    b8 = _round_up(batch, 8)
    tb = min(tb_cap, b8)
    # Prefer >=2 grid steps when the batch allows: lets the "parallel" batch
    # axis shard across v7x's 2 TensorCores and keeps the pipeline busy.
    if b8 > 8 and b8 // tb < 2:
        tb = _round_up(-(-b8 // 2), 8)
    tb = _round_up(tb, 8)
    b_final = _round_up(b8, tb)
    grid = (b_final // tb,)

    # Pad ONLY the batch dimension -- no (B, 128) zero slab in HBM.  The x
    # BlockSpec keeps the natural c_in minor dim (legal: block == full extent).
    if b_final != batch:
        x_in = jnp.zeros((b_final, c_in), x.dtype).at[:batch].set(x)
    else:
        x_in = x

    n_mats = w_slab.shape[1] // c_pad
    cost = pl.CostEstimate(
        flops=2 * b_final * c_pad * c_pad * n_mats,
        transcendentals=0,
        bytes_accessed=int(x_in.size * x_in.dtype.itemsize
                           + b_final * c_pad * 4
                           + w_slab.size * w_slab.dtype.itemsize
                           + b_slab.size * 4))

    out_full = pl.pallas_call(
        functools.partial(_tcn_kernel, levels=tuple(levels_meta),
                          clf=tuple(clf_meta), c_pad=c_pad),
        out_shape=jax.ShapeDtypeStruct((b_final, c_pad), jnp.float32),
        grid=grid,
        in_specs=[
            pl.BlockSpec((tb, c_in), lambda i: (i, 0)),       # x batch tile
            pl.BlockSpec(w_slab.shape, lambda i: (0, 0)),     # bf16 weights, resident
            pl.BlockSpec(b_slab.shape, lambda i: (0, 0)),     # f32 biases, resident
        ],
        out_specs=pl.BlockSpec((tb, c_pad), lambda i: (i, 0)),
        compiler_params=pltpu.CompilerParams(
            dimension_semantics=("parallel",)),
        cost_estimate=cost,
    )(x_in, w_slab, b_slab)

    return out_full[:batch, :num_classes]


# --------------------------- parameter construction ---------------------------
def _weight_norm(v, g):
    """torch weight_norm: w = g * v / ||v||, norm over (in, k) per out channel."""
    norm = jnp.sqrt(jnp.sum(v * v, axis=(1, 2)))
    return v * (g / norm)[:, None, None]


def build_tcn_params(key, num_inputs, num_channels, num_classes, kernel_size):
    """Structured params matching the torch module (for the reference path)."""
    levels = []
    in_c = num_inputs
    for i, out_c in enumerate(num_channels):
        key, k1, k2, k3, k4, k5, k6, k7, k8 = jax.random.split(key, 9)
        dilation = 2 ** i
        padding = (kernel_size - 1) * dilation

        v1 = 0.01 * jax.random.normal(k1, (out_c, in_c, kernel_size), jnp.float32)
        g1 = 1.0 + 0.1 * jax.random.normal(k2, (out_c,), jnp.float32)
        b1 = 0.1 * jax.random.normal(k3, (out_c,), jnp.float32)
        v2 = 0.01 * jax.random.normal(k4, (out_c, out_c, kernel_size), jnp.float32)
        g2 = 1.0 + 0.1 * jax.random.normal(k5, (out_c,), jnp.float32)
        b2 = 0.1 * jax.random.normal(k6, (out_c,), jnp.float32)
        w1 = _weight_norm(v1, g1)                      # (out, in, k)
        w2 = _weight_norm(v2, g2)

        if in_c != out_c:
            wd = 0.01 * jax.random.normal(k7, (out_c, in_c, 1), jnp.float32)
            bd = 0.1 * jax.random.normal(k8, (out_c,), jnp.float32)
        else:
            wd, bd = None, None

        levels.append(dict(w1=w1, b1=b1, w2=w2, b2=b2, wd=wd, bd=bd,
                           dilation=dilation, padding=padding))
        in_c = out_c

    key, kc1, kc2 = jax.random.split(key, 3)
    wc = 0.1 * jax.random.normal(kc1, (num_classes, num_channels[-1]), jnp.float32)
    bc = 0.1 * jax.random.normal(kc2, (num_classes,), jnp.float32)
    return dict(levels=levels, wc=wc, bc=bc)


def pack_tcn_params(params, num_inputs, num_channels, num_classes):
    """Pack all weights into a single bf16 weight slab (C_PAD, M*C_PAD) and all
    biases into a single f32 bias slab (NB, C_PAD), zero-padded to lane-dense
    128-wide blocks.  Returns (w_slab, b_slab, levels_meta, clf_meta, c_pad)."""
    max_c = max([num_inputs, num_classes] + list(num_channels))
    c_pad = 128 * (-(-max_c // 128))

    def pad_w(w):                                   # (k, n) -> (c_pad, c_pad)
        return jnp.zeros((c_pad, c_pad), jnp.float32).at[
            :w.shape[0], :w.shape[1]].set(w)

    def pad_b(b):                                   # (n,) -> (c_pad,)
        return jnp.zeros((c_pad,), jnp.float32).at[:b.shape[0]].set(b)

    w_blocks, b_rows, levels_meta = [], [], []
    for lvl in params["levels"]:
        has_ds = lvl["wd"] is not None
        # Kernel-side matmul form: last kernel tap, transposed to (in, out).
        w1c = len(w_blocks)
        w_blocks.append(pad_w(lvl["w1"][:, :, -1].T))
        b1r = len(b_rows)
        b_rows.append(pad_b(lvl["b1"]))
        if has_ds:                                  # Wd adjacent to W1 -> fusable
            w_blocks.append(pad_w(lvl["wd"][:, :, 0].T))
            bdr = len(b_rows)
            b_rows.append(pad_b(lvl["bd"]))
        else:
            bdr = -1
        w2c = len(w_blocks)
        w_blocks.append(pad_w(lvl["w2"][:, :, -1].T))
        b2r = len(b_rows)
        b_rows.append(pad_b(lvl["b2"]))
        levels_meta.append((w1c, b1r, w2c, b2r, has_ds, bdr))

    wcc = len(w_blocks)
    w_blocks.append(pad_w(params["wc"].T))
    bcr = len(b_rows)
    b_rows.append(pad_b(params["bc"]))

    # bf16 weight slab for the MXU; biases stay f32 for the f32 epilogue.
    w_slab = jnp.concatenate(w_blocks, axis=1).astype(jnp.bfloat16)
    b_slab = jnp.stack(b_rows, axis=0)              # (NB, c_pad) f32
    return w_slab, b_slab, tuple(levels_meta), (wcc, bcr), c_pad


# ------------------------- pure-JAX reference (torch semantics) ---------------
def _causal_conv1d(x, w, b, dilation, padding):
    """torch Conv1d (NCL) with symmetric padding, followed by Chomp1d."""
    y = jax.lax.conv_general_dilated(
        x, w, window_strides=(1,), padding=[(padding, padding)],
        rhs_dilation=(dilation,), dimension_numbers=("NCH", "OIH", "NCH"),
        precision=jax.lax.Precision.HIGHEST)
    y = y + b[None, :, None]
    if padding > 0:
        y = y[:, :, :-padding]
    return y


def tcn_forward_ref(x, params):
    h = x[:, :, None]                               # (N, C, 1) == unsqueeze(2)
    for lvl in params["levels"]:
        out = jnp.maximum(_causal_conv1d(h, lvl["w1"], lvl["b1"],
                                         lvl["dilation"], lvl["padding"]), 0.0)
        out = jnp.maximum(_causal_conv1d(out, lvl["w2"], lvl["b2"],
                                         lvl["dilation"], lvl["padding"]), 0.0)
        if lvl["wd"] is not None:
            res = _causal_conv1d(h, lvl["wd"], lvl["bd"], 1, 0)
        else:
            res = h
        h = jnp.maximum(out + res, 0.0)
    y = jnp.mean(h, axis=2)                         # mean over L (=1)
    return y @ params["wc"].T + params["bc"]


# ------------------------------------ main ------------------------------------
if __name__ == "__main__":
    batch = 8
    num_inputs = 16
    num_channels = [32, 32]     # level 0 has a downsample (16 != 32), level 1 not
    num_classes = 10
    kernel_size = 2

    key = jax.random.PRNGKey(0)
    key, kx = jax.random.split(key)
    x = jax.random.normal(kx, (batch, num_inputs), jnp.float32)

    params = build_tcn_params(key, num_inputs, num_channels, num_classes,
                              kernel_size)
    w_slab, b_slab, levels_meta, clf_meta, c_pad = pack_tcn_params(
        params, num_inputs, num_channels, num_classes)

    out = tcn_forward_pallas(x, w_slab, b_slab, levels_meta, clf_meta,
                             num_classes)
    out = jax.block_until_ready(out)

    ref = jax.block_until_ready(tcn_forward_ref(x, params))
    # Tolerance loosened vs the f32 reference because the kernel feeds bf16
    # inputs to the MXU (accumulation stays f32).
    if not np.allclose(np.asarray(out), np.asarray(ref), rtol=5e-2, atol=5e-2):
        raise AssertionError("Pallas TCN output mismatch vs reference")

    print("KERNEL_OK")
</pallas_src>

<mosaic_0001>
module attributes {stable_mosaic.version = 11 : i64} {
  func.func @_tcn_kernel(%arg0: i32, %arg1: memref<8x16xf32, #tpu.memory_space<vmem>>, %arg2: memref<128x768xbf16, #tpu.memory_space<vmem>>, %arg3: memref<6x128xf32, #tpu.memory_space<vmem>>, %arg4: memref<8x128xf32, #tpu.memory_space<vmem>>) attributes {dimension_semantics = [#tpu.dimension_semantics<parallel>], iteration_bounds = array<i64: 1>, scalar_prefetch = 0 : i64, scratch_operands = 0 : i64, tpu.core_type = #tpu.core_type<tc>, window_params = [{transform_indices = @transform_0, window_bounds = array<i64: 8, 16>}, {pipeline_mode = #tpu.pipeline_mode<synchronous>, transform_indices = @transform_1, window_bounds = array<i64: 128, 768>}, {pipeline_mode = #tpu.pipeline_mode<synchronous>, transform_indices = @transform_2, window_bounds = array<i64: 6, 128>}, {transform_indices = @transform_3, window_bounds = array<i64: 8, 128>}]} {
    %c0 = arith.constant 0 : index
    %c0_0 = arith.constant 0 : index
    %0 = vector.load %arg1[%c0, %c0_0] : memref<8x16xf32, #tpu.memory_space<vmem>>, vector<8x16xf32>
    %1 = arith.truncf %0 : vector<8x16xf32> to vector<8x16xbf16>
    %c0_1 = arith.constant 0 : index
    %c0_2 = arith.constant 0 : index
    %2 = vector.load %arg3[%c0_1, %c0_2] : memref<6x128xf32, #tpu.memory_space<vmem>>, vector<1x128xf32>
    %c2 = arith.constant 2 : index
    %c0_3 = arith.constant 0 : index
    %3 = vector.load %arg3[%c2, %c0_3] : memref<6x128xf32, #tpu.memory_space<vmem>>, vector<1x128xf32>
    %c1 = arith.constant 1 : index
    %c0_4 = arith.constant 0 : index
    %4 = vector.load %arg3[%c1, %c0_4] : memref<6x128xf32, #tpu.memory_space<vmem>>, vector<1x128xf32>
    %c0_5 = arith.constant 0 : index
    %c0_6 = arith.constant 0 : index
    %5 = vector.load %arg2[%c0_5, %c0_6] : memref<128x768xbf16, #tpu.memory_space<vmem>>, vector<16x256xbf16>
    %cst = arith.constant dense<0.000000e+00> : vector<8x256xf32>
    %6 = tpu.matmul %1, %5, %cst {dimension_numbers = #tpu.dot_dimension_numbers<[1], [0], [0], [1], [0, 0, 1, 1], [], []>} : vector<8x16xbf16>, vector<16x256xbf16>, vector<8x256xf32> -> vector<8x256xf32>
    %7 = vector.extract_strided_slice %6 {offsets = [0, 0], sizes = [8, 128], strides = [1, 1]} : vector<8x256xf32> to vector<8x128xf32>
    %8 = vector.broadcast %2 : vector<1x128xf32> to vector<8x128xf32>
    %9 = arith.addf %7, %8 : vector<8x128xf32>
    %cst_7 = arith.constant 0.000000e+00 : f32
    %10 = vector.broadcast %cst_7 : f32 to vector<8x128xf32>
    %11 = arith.maximumf %9, %10 : vector<8x128xf32>
    %12 = vector.extract_strided_slice %6 {offsets = [0, 128], sizes = [8, 128], strides = [1, 1]} : vector<8x256xf32> to vector<8x128xf32>
    %13 = vector.broadcast %4 : vector<1x128xf32> to vector<8x128xf32>
    %14 = arith.addf %12, %13 : vector<8x128xf32>
    %15 = arith.truncf %11 : vector<8x128xf32> to vector<8x128xbf16>
    %c0_8 = arith.constant 0 : index
    %c256 = arith.constant 256 : index
    %16 = vector.load %arg2[%c0_8, %c256] : memref<128x768xbf16, #tpu.memory_space<vmem>>, vector<128x128xbf16>
    %cst_9 = arith.constant dense<0.000000e+00> : vector<8x128xf32>
    %17 = tpu.matmul %15, %16, %cst_9 {dimension_numbers = #tpu.dot_dimension_numbers<[1], [0], [0], [1], [0, 0, 1, 1], [], []>} : vector<8x128xbf16>, vector<128x128xbf16>, vector<8x128xf32> -> vector<8x128xf32>
    %18 = vector.broadcast %3 : vector<1x128xf32> to vector<8x128xf32>
    %19 = arith.addf %17, %18 : vector<8x128xf32>
    %cst_10 = arith.constant 0.000000e+00 : f32
    %20 = vector.broadcast %cst_10 : f32 to vector<8x128xf32>
    %21 = arith.maximumf %19, %20 : vector<8x128xf32>
    %22 = arith.addf %21, %14 : vector<8x128xf32>
    %cst_11 = arith.constant 0.000000e+00 : f32
    %23 = vector.broadcast %cst_11 : f32 to vector<8x128xf32>
    %24 = arith.maximumf %22, %23 : vector<8x128xf32>
    %25 = arith.truncf %24 : vector<8x128xf32> to vector<8x128xbf16>
    %c3 = arith.constant 3 : index
    %c0_12 = arith.constant 0 : index
    %26 = vector.load %arg3[%c3, %c0_12] : memref<6x128xf32, #tpu.memory_space<vmem>>, vector<1x128xf32>
    %c4 = arith.constant 4 : index
    %c0_13 = arith.constant 0 : index
    %27 = vector.load %arg3[%c4, %c0_13] : memref<6x128xf32, #tpu.memory_space<vmem>>, vector<1x128xf32>
    %c0_14 = arith.constant 0 : index
    %c384 = arith.constant 384 : index
    %28 = vector.load %arg2[%c0_14, %c384] : memref<128x768xbf16, #tpu.memory_space<vmem>>, vector<128x128xbf16>
    %cst_15 = arith.constant dense<0.000000e+00> : vector<8x128xf32>
    %29 = tpu.matmul %25, %28, %cst_15 {dimension_numbers = #tpu.dot_dimension_numbers<[1], [0], [0], [1], [0, 0, 1, 1], [], []>} : vector<8x128xbf16>, vector<128x128xbf16>, vector<8x128xf32> -> vector<8x128xf32>
    %30 = vector.broadcast %26 : vector<1x128xf32> to vector<8x128xf32>
    %31 = arith.addf %29, %30 : vector<8x128xf32>
    %cst_16 = arith.constant 0.000000e+00 : f32
    %32 = vector.broadcast %cst_16 : f32 to vector<8x128xf32>
    %33 = arith.maximumf %31, %32 : vector<8x128xf32>
    %34 = arith.truncf %33 : vector<8x128xf32> to vector<8x128xbf16>
    %c0_17 = arith.constant 0 : index
    %c512 = arith.constant 512 : index
    %35 = vector.load %arg2[%c0_17, %c512] : memref<128x768xbf16, #tpu.memory_space<vmem>>, vector<128x128xbf16>
    %cst_18 = arith.constant dense<0.000000e+00> : vector<8x128xf32>
    %36 = tpu.matmul %34, %35, %cst_18 {dimension_numbers = #tpu.dot_dimension_numbers<[1], [0], [0], [1], [0, 0, 1, 1], [], []>} : vector<8x128xbf16>, vector<128x128xbf16>, vector<8x128xf32> -> vector<8x128xf32>
    %37 = vector.broadcast %27 : vector<1x128xf32> to vector<8x128xf32>
    %38 = arith.addf %36, %37 : vector<8x128xf32>
    %cst_19 = arith.constant 0.000000e+00 : f32
    %39 = vector.broadcast %cst_19 : f32 to vector<8x128xf32>
    %40 = arith.maximumf %38, %39 : vector<8x128xf32>
    %41 = arith.addf %40, %24 : vector<8x128xf32>
    %cst_20 = arith.constant 0.000000e+00 : f32
    %42 = vector.broadcast %cst_20 : f32 to vector<8x128xf32>
    %43 = arith.maximumf %41, %42 : vector<8x128xf32>
    %44 = arith.truncf %43 : vector<8x128xf32> to vector<8x128xbf16>
    %c0_21 = arith.constant 0 : index
    %c640 = arith.constant 640 : index
    %45 = vector.load %arg2[%c0_21, %c640] : memref<128x768xbf16, #tpu.memory_space<vmem>>, vector<128x128xbf16>
    %cst_22 = arith.constant dense<0.000000e+00> : vector<8x128xf32>
    %46 = tpu.matmul %44, %45, %cst_22 {dimension_numbers = #tpu.dot_dimension_numbers<[1], [0], [0], [1], [0, 0, 1, 1], [], []>} : vector<8x128xbf16>, vector<128x128xbf16>, vector<8x128xf32> -> vector<8x128xf32>
    %c5 = arith.constant 5 : index
    %c0_23 = arith.constant 0 : index
    %47 = vector.load %arg3[%c5, %c0_23] : memref<6x128xf32, #tpu.memory_space<vmem>>, vector<1x128xf32>
    %48 = vector.broadcast %47 : vector<1x128xf32> to vector<8x128xf32>
    %49 = arith.addf %46, %48 : vector<8x128xf32>
    %c0_24 = arith.constant 0 : index
    %c0_25 = arith.constant 0 : index
    %50 = vector.load %arg4[%c0_24, %c0_25] : memref<8x128xf32, #tpu.memory_space<vmem>>, vector<8x128xf32>
    tpu.vector_store %arg4[%c0_24, %c0_25], %49 {strides = array<i32>} : memref<8x128xf32, #tpu.memory_space<vmem>>, vector<8x128xf32>,
    return
  }
  func.func @transform_0(%arg0: i32) -> (i32, i32) {
    %c0_i32 = arith.constant 0 : i32
    %c0_i32_0 = arith.constant 0 : i32
    return %arg0, %c0_i32 : i32, i32
  }
  func.func @transform_1(%arg0: i32) -> (i32, i32) {
    %c0_i32 = arith.constant 0 : i32
    %c0_i32_0 = arith.constant 0 : i32
    %c0_i32_1 = arith.constant 0 : i32
    return %c0_i32, %c0_i32_0 : i32, i32
  }
  func.func @transform_2(%arg0: i32) -> (i32, i32) {
    %c0_i32 = arith.constant 0 : i32
    %c0_i32_0 = arith.constant 0 : i32
    %c0_i32_1 = arith.constant 0 : i32
    return %c0_i32, %c0_i32_0 : i32, i32
  }
  func.func @transform_3(%arg0: i32) -> (i32, i32) {
    %c0_i32 = arith.constant 0 : i32
    %c0_i32_0 = arith.constant 0 : i32
    return %arg0, %c0_i32 : i32, i32
  }
}

</mosaic_0001>

<bundles_post_ra>
// kernel: tpu_custom_call.1
= control target key start
LH: loop header
LB: loop body
LE: loop exit
PB: predicated region body
PF: predicated region fallthrough
CT: control target
= control target key end

     0   :  { %8 = vsyncpa [#allocation3], 0  ;;  %s957_s0 = inlined_call_operand.hbm [shape: f32[8,16], index: 0, kind: input, shape index: {}]   ;;  %s958_s1 = inlined_call_operand.hbm [shape: bf16[128,768], index: 1, kind: input, shape index: {}]   ;;  %s959_s2 = inlined_call_operand.hbm [shape: f32[6,128], index: 2, kind: input, shape index: {}]   ;;  %s960_s3 = inlined_call_operand.hbm [shape: f32[8,128], index: 3, kind: output, shape index: {}]  }
   0x1   :  { %9 = vsyncpa [#allocation6], 0 }
   0x2   :  { %10 = vsyncpa [#allocation4], 0  ;;  %s876_s12 = smov [#allocation5]  }
   0x3   :  { %s26_s13 = sshll.u32 %s876_s12, 4  ;;  %s27_s13 = int_to_ptr.vmem [resolvable:$true] %s26_s13 }
   0x4   :  { %s798_s14 = scalar_lea.vmem %s27_s13, 6144  ;;  %p803_p1 = scmp.lt.s32.totalorder %s27_s13, %s27_s13 }
   0x5   :  { %p799_p0 = scmp.ne.s32.totalorder %s27_s13, %s798_s14  ;;  %p804_p2 = scmp.lt.s32.totalorder %s798_s14, %s798_s14 }
   0x7   :  { %p805_p3 = por %p804_p2, %p803_p1 }
   0x9   :  { %p806_p4 = pnand %p805_p3, %p799_p0 }
   0xb   :  { %809 = shalt.err (!%p806_p4)
}
   0xc   :  { %s877_s15 = smov 384   ;;  %s878_s16 = smov 24  }
   0xd   :  { %32 = dma.hbm_to_vmem [thread:$0]  %s958_s1, 6144, %s27_s13, [#allocation6], %s877_s15, %s877_s15, %s878_s16  }
   0xe   :  { %s879_s19 = smov [#allocation2]   ;;  %s880_s21 = smov [#allocation7]  }
   0xf   :  { %s17_s20 = sshll.u32 %s879_s19, 4  ;;  %s39_s22 = sshll.u32 %s880_s21, 4  ;;  %s18_s20 = int_to_ptr.vmem [resolvable:$true] %s17_s20  ;;  %s40_s22 = int_to_ptr.vmem [resolvable:$true] %s39_s22 }
  0x10   :  { %s818_s23 = scalar_lea.vmem %s18_s20, 128  ;;  %p823_p6 = scmp.lt.s32.totalorder %s18_s20, %s18_s20 }
  0x11   :  { %p819_p5 = scmp.ne.s32.totalorder %s18_s20, %s818_s23  ;;  %p824_p7 = scmp.lt.s32.totalorder %s818_s23, %s818_s23 }
  0x13   :  { %p825_p8 = por %p824_p7, %p823_p6 }
  0x15   :  { %p826_p9 = pnand %p825_p8, %p819_p5 }
  0x17   :  { %829 = shalt.err (!%p826_p9)
}
  0x18   :  { %20 = dma.hbm_to_vmem [thread:$0]  %s957_s0, 128, %s18_s20, [#allocation3]  }
  0x19   :  { %s838_s26 = scalar_lea.vmem %s40_s22, 128  ;;  %p843_p11 = scmp.lt.s32.totalorder %s40_s22, %s40_s22 }
  0x1a   :  { %p839_p10 = scmp.ne.s32.totalorder %s40_s22, %s838_s26  ;;  %p844_p12 = scmp.lt.s32.totalorder %s838_s26, %s838_s26 }
  0x1c   :  { %p845_p13 = por %p844_p12, %p843_p11 }
  0x1e   :  { %p846_p0 = pnand %p845_p13, %p839_p10 }
  0x20   :  { %849 = shalt.err (!%p846_p0)
}
  0x21   :  { %42 = dma.hbm_to_vmem [thread:$0]  %s959_s2, 128, %s40_s22, [#allocation6]  }
  0x22   :  { %870 = dma.done.wait [#allocation3], 128  }
  0x23   :  { %871 = vsyncadd [#allocation3], 4294967168 }
  0x24   :  { %872 = dma.done.wait [#allocation6], 6272  }
  0x25   :  { %873 = vsyncadd [#allocation6], 4294961024  ;;  %v881_v0 = vmov 0   ;;  %v882_v1 = vmov 0.0   ;;  %v755_v2 = vld [vmem:[#allocation5 + $0x4] ss:$24 sps:$4 sm:$0xff]  }
  0x26   :  { %106 = vmatprep.mubr.bf16.mxu0 %v881_v0  ;;  %666 = vmatprep.subr.bf16.mxu1 %v882_v1  ;;  %v757_v3 = vld [vmem:[#allocation5] ss:$24 sps:$4 sm:$0xff]   ;;  %vm70_vm0 = vcmask 130048   ;;  %vm883_vm1 = vmmov 0   ;;  %v766_v14 = vld [vmem:[#allocation5 + $0x15c] ss:$24 sps:$4 sm:$0xff]  }
  0x27   :  { %v53_v4 = vld [vmem:[#allocation2] sm:$0xff]  ;;  %88 = vmatprep.subr.bf16.mxu0 %v755_v2  ;;  %v759_v7 = vld [vmem:[#allocation5 + $0x128] ss:$24 sps:$4 sm:$0xff]   ;;  %682 = vmatprep.mubr.msk.bf16.mxu1 %vm883_vm1, %v882_v1  ;;  %v767_v15 = vld [vmem:[#allocation5 + $0x12c] ss:$24 sps:$4 sm:$0xff]   ;;  %s884_s0 = smov [#allocation8]  }
  0x28   :  { %v54_v5 = vpack.c.bf16 %v53_v4, %v53_v4  ;;  %v758_v6 = vld [vmem:[#allocation5 + $0x158] ss:$24 sps:$4 sm:$0xff]   ;;  %89 = vmatpush1.bf16.msra.mxu0 %v757_v3  ;;  %v761_v9 = vld [vmem:[#allocation5 + $0xc8] ss:$24 sps:$4 sm:$0xff]   ;;  %v768_v16 = vld [vmem:[#allocation5 + $0xfc] ss:$24 sps:$4 sm:$0xff]  }
  0x29   :  { %667 = vmatpush3.bf16.msra.mxu1 %v758_v6  ;;  %686 = vmatprep.subr.bf16.mxu0 %v882_v1  ;;  %v760_v8 = vld [vmem:[#allocation5 + $0xf8] ss:$24 sps:$4 sm:$0xff]   ;;  %v763_v11 = vld [vmem:[#allocation5 + $0x68] ss:$24 sps:$4 sm:$0xff]   ;;  %v769_v17 = vld [vmem:[#allocation5 + $0xcc] ss:$24 sps:$4 sm:$0xff]  }
  0x2a   :  { %668 = vmatprep.subr.bf16.mxu1 %v882_v1  ;;  %v762_v10 = vld [vmem:[#allocation5 + $0x98] ss:$24 sps:$4 sm:$0xff]   ;;  %v765_v13 = vld [vmem:[#allocation5 + $0x8] ss:$24 sps:$4 sm:$0xff]   ;;  %v770_v18 = vld [vmem:[#allocation5 + $0x9c] ss:$24 sps:$4 sm:$0xff]  }
  0x2b   :  { %591 = vmatmul.mubr.msk.bf16.vlgmr.msra.gmra.mxu0 %vm70_vm0, %v54_v5  ;;  %v764_v12 = vld [vmem:[#allocation5 + $0x38] ss:$24 sps:$4 sm:$0xff]   ;;  %v592_v19 = vld [vmem:[#allocation7] ss:$0 sm:$0xff]  ;;  %v771_v27 = vld [vmem:[#allocation5 + $0x6c] ss:$24 sps:$4 sm:$0xff]  }
  0x2c   :  { %702 = vmatprep.mubr.msk.bf16.mxu0 %vm883_vm1, %v882_v1  ;;  %687 = vmatpush3.bf16.msra.mxu0 %v766_v14  ;;  %v772_v28 = vld [vmem:[#allocation5 + $0x3c] ss:$24 sps:$4 sm:$0xff]   ;;  %v773_v29 = vld [vmem:[#allocation5 + $0xc] ss:$24 sps:$4 sm:$0xff]   ;;  %v774_v30 = vld [vmem:[#allocation5 + $0x160] ss:$24 sps:$4 sm:$0xff]  }
  0x2d   :  { %669 = vmatpush3.bf16.msra.mxu1 %v759_v7  ;;  %688 = vmatprep.subr.bf16.mxu0 %v882_v1  ;;  %v775_v31 = vld [vmem:[#allocation5 + $0x130] ss:$24 sps:$4 sm:$0xff]   ;;  %v776_v32 = vld [vmem:[#allocation5 + $0x100] ss:$24 sps:$4 sm:$0xff]   ;;  %v782_v50 = vld [vmem:[#allocation5 + $0x164] ss:$24 sps:$4 sm:$0xff]  }
  0x2e   :  { %670 = vmatprep.subr.bf16.mxu1 %v882_v1  ;;  %v777_v33 = vld [vmem:[#allocation5 + $0xd0] ss:$24 sps:$4 sm:$0xff]   ;;  %v778_v34 = vld [vmem:[#allocation5 + $0xa0] ss:$24 sps:$4 sm:$0xff]   ;;  %v783_v51 = vld [vmem:[#allocation5 + $0x134] ss:$24 sps:$4 sm:$0xff]  }
  0x2f   :  { %v779_v35 = vld [vmem:[#allocation5 + $0x70] ss:$24 sps:$4 sm:$0xff]   ;;  %v594_v36 = vld [vmem:[#allocation7 + $0x2] ss:$0 sm:$0xff]  ;;  %v593_v37 = vld [vmem:[#allocation7 + $0x1] ss:$0 sm:$0xff] }
  0x30   :  { %689 = vmatpush3.bf16.msra.mxu0 %v767_v15  ;;  %v780_v48 = vld [vmem:[#allocation5 + $0x40] ss:$24 sps:$4 sm:$0xff]   ;;  %v781_v49 = vld [vmem:[#allocation5 + $0x10] ss:$24 sps:$4 sm:$0xff]   ;;  %v784_v52 = vld [vmem:[#allocation5 + $0x104] ss:$24 sps:$4 sm:$0xff]  }
  0x31   :  { %671 = vmatpush3.bf16.msra.mxu1 %v760_v8  ;;  %690 = vmatprep.subr.bf16.mxu0 %v882_v1  ;;  %v785_v53 = vld [vmem:[#allocation5 + $0xd4] ss:$24 sps:$4 sm:$0xff]   ;;  %v786_v54 = vld [vmem:[#allocation5 + $0xa4] ss:$24 sps:$4 sm:$0xff]   ;;  %v603_v55 = vld [vmem:[#allocation7 + $0x3] ss:$0 sm:$0xff] }
  0x32   :  { %672 = vmatprep.subr.bf16.mxu1 %v882_v1  ;;  %v787_v63 = vld [vmem:[#allocation5 + $0x74] ss:$24 sps:$4 sm:$0xff]   ;;  %v788_v0 = vld [vmem:[#allocation5 + $0x44] ss:$24 sps:$4 sm:$0xff]   ;;  %s579_s2 = sshll.u32 %s884_s0, 4  ;;  %s580_s2 = int_to_ptr.vmem [resolvable:$true] %s579_s2 }
  0x33   :  { %v789_v2 = vld [vmem:[#allocation5 + $0x14] ss:$24 sps:$4 sm:$0xff]   ;;  %v612_v3 = vld [vmem:[#allocation7 + $0x4] ss:$0 sm:$0xff]  ;;  %s850_s28 = scalar_lea.vmem %s580_s2, 128  ;;  %p855_p2 = scmp.lt.s32.totalorder %s580_s2, %s580_s2 }
  0x34   :  { %691 = vmatpush3.bf16.msra.mxu0 %v768_v16  ;;  %p851_p1 = scmp.ne.s32.totalorder %s580_s2, %s850_s28  ;;  %p856_p3 = scmp.lt.s32.totalorder %s850_s28, %s850_s28 }
  0x35   :  { %673 = vmatpush3.bf16.msra.mxu1 %v761_v9  ;;  %692 = vmatprep.subr.bf16.mxu0 %v882_v1 }
  0x36   :  { %674 = vmatprep.subr.bf16.mxu1 %v882_v1  ;;  %p857_p4 = por %p856_p3, %p855_p2 }
  0x38   :  { %693 = vmatpush3.bf16.msra.mxu0 %v769_v17  ;;  %p858_p5 = pnand %p857_p4, %p851_p1 }
  0x39   :  { %675 = vmatpush3.bf16.msra.mxu1 %v762_v10  ;;  %694 = vmatprep.subr.bf16.mxu0 %v882_v1 }
  0x3a   :  { %676 = vmatprep.subr.bf16.mxu1 %v882_v1 }
  0x3c   :  { %695 = vmatpush3.bf16.msra.mxu0 %v770_v18 }
  0x3d   :  { %677 = vmatpush3.bf16.msra.mxu1 %v763_v11  ;;  %696 = vmatprep.subr.bf16.mxu0 %v882_v1 }
  0x3e   :  { %678 = vmatprep.subr.bf16.mxu1 %v882_v1 }
  0x40   :  { %697 = vmatpush3.bf16.msra.mxu0 %v771_v27 }
  0x41   :  { %679 = vmatpush3.bf16.msra.mxu1 %v764_v12  ;;  %698 = vmatprep.subr.bf16.mxu0 %v882_v1 }
  0x42   :  { %680 = vmatprep.subr.bf16.mxu1 %v882_v1 }
  0x44   :  { %699 = vmatpush3.bf16.msra.mxu0 %v772_v28 }
  0x45   :  { %681 = vmatpush3.bf16.msra.mxu1 %v765_v13  ;;  %700 = vmatprep.subr.bf16.mxu0 %v882_v1  ;;  %v621_v13 = vld [vmem:[#allocation7 + $0x5] ss:$0 sm:$0xff] }
  0x46   :  { %706 = vmatprep.subr.bf16.mxu1 %v882_v1 }
  0x48   :  { %701 = vmatpush3.bf16.msra.mxu0 %v773_v29 }
  0x49   :  { %726 = vmatprep.subr.bf16.mxu0 %v882_v1 }
  0xeb   :  { %v108_v20 = vpop.f32.mrf.mxu0 }
  0xec   :  { %v119_v21 = vadd.f32 %v592_v19, %v108_v20 }
  0xed   :  { %v110_v22 = vpop.f32.mrf.mxu0 }
  0xee   :  { %v120_v23 = vmax.f32 %v119_v21, 0.0  ;;  %v125_v41 = vadd.f32 %v593_v37, %v110_v22 }
  0xef   :  { %v112_v24 = vpop.f32.mrf.mxu0 }
  0xf0   :  { %v126_v25 = vpack.c.bf16 %v120_v23, %v120_v23 }
  0xf1   :  { %v113_v26 = vpop.f32.mrf.mxu0 }
  0xf2   :  { %683 = vmatmul.mubr.bf16.vlgmr.msra.gmra.mxu1 %v126_v25 }
  0xf3   :  { %722 = vmatprep.mubr.msk.bf16.mxu1 %vm883_vm1, %v882_v1  ;;  %707 = vmatpush3.bf16.msra.mxu1 %v774_v30 }
  0xf4   :  { %708 = vmatprep.subr.bf16.mxu1 %v882_v1 }
  0xf7   :  { %709 = vmatpush3.bf16.msra.mxu1 %v775_v31 }
  0xf8   :  { %710 = vmatprep.subr.bf16.mxu1 %v882_v1 }
  0xfb   :  { %711 = vmatpush3.bf16.msra.mxu1 %v776_v32 }
  0xfc   :  { %712 = vmatprep.subr.bf16.mxu1 %v882_v1 }
  0xff   :  { %713 = vmatpush3.bf16.msra.mxu1 %v777_v33 }
 0x100   :  { %714 = vmatprep.subr.bf16.mxu1 %v882_v1 }
 0x103   :  { %715 = vmatpush3.bf16.msra.mxu1 %v778_v34 }
 0x104   :  { %716 = vmatprep.subr.bf16.mxu1 %v882_v1 }
 0x107   :  { %717 = vmatpush3.bf16.msra.mxu1 %v779_v35 }
 0x108   :  { %718 = vmatprep.subr.bf16.mxu1 %v882_v1 }
 0x10b   :  { %719 = vmatpush3.bf16.msra.mxu1 %v780_v48 }
 0x10c   :  { %720 = vmatprep.subr.bf16.mxu1 %v882_v1 }
 0x10f   :  { %721 = vmatpush3.bf16.msra.mxu1 %v781_v49 }
 0x1b2   :  { %v229_v38 = vpop.f32.mrf.mxu1 }
 0x1b3   :  { %v230_v39 = vadd.f32 %v594_v36, %v229_v38 }
 0x1b4   :  { %v684_v40 = vpop.f32.mrf.mxu1 }
 0x1b5   :  { %v235_v42 = vmax.f32 %v230_v39, 0.0 }
 0x1b6   :  { %v232_v43 = vpop.f32.mrf.mxu1 }
 0x1b7   :  { %v236_v44 = vadd.f32 %v235_v42, %v125_v41 }
 0x1b8   :  { %v685_v45 = vpop.f32.mrf.mxu1 }
 0x1b9   :  { %v237_v46 = vmax.f32 %v236_v44, 0.0 }
 0x1bb   :  { %v238_v47 = vpack.c.bf16 %v237_v46, %v237_v46 }
 0x1bd   :  { %703 = vmatmul.mubr.bf16.vlgmr.msra.gmra.mxu0 %v238_v47 }
 0x1be   :  { %742 = vmatprep.mubr.msk.bf16.mxu0 %vm883_vm1, %v882_v1  ;;  %727 = vmatpush3.bf16.msra.mxu0 %v782_v50 }
 0x1bf   :  { %728 = vmatprep.subr.bf16.mxu0 %v882_v1 }
 0x1c2   :  { %729 = vmatpush3.bf16.msra.mxu0 %v783_v51 }
 0x1c3   :  { %730 = vmatprep.subr.bf16.mxu0 %v882_v1 }
 0x1c6   :  { %731 = vmatpush3.bf16.msra.mxu0 %v784_v52 }
 0x1c7   :  { %732 = vmatprep.subr.bf16.mxu0 %v882_v1 }
 0x1ca   :  { %733 = vmatpush3.bf16.msra.mxu0 %v785_v53 }
 0x1cb   :  { %734 = vmatprep.subr.bf16.mxu0 %v882_v1 }
 0x1ce   :  { %735 = vmatpush3.bf16.msra.mxu0 %v786_v54 }
 0x1cf   :  { %736 = vmatprep.subr.bf16.mxu0 %v882_v1 }
 0x1d2   :  { %737 = vmatpush3.bf16.msra.mxu0 %v787_v63 }
 0x1d3   :  { %738 = vmatprep.subr.bf16.mxu0 %v882_v1 }
 0x1d6   :  { %739 = vmatpush3.bf16.msra.mxu0 %v788_v0 }
 0x1d7   :  { %740 = vmatprep.subr.bf16.mxu0 %v882_v1 }
 0x1da   :  { %741 = vmatpush3.bf16.msra.mxu0 %v789_v2 }
 0x27d   :  { %v343_v56 = vpop.f32.mrf.mxu0 }
 0x27e   :  { %v344_v57 = vadd.f32 %v603_v55, %v343_v56 }
 0x27f   :  { %v704_v58 = vpop.f32.mrf.mxu0 }
 0x280   :  { %v349_v59 = vmax.f32 %v344_v57, 0.0 }
 0x281   :  { %v346_v60 = vpop.f32.mrf.mxu0 }
 0x282   :  { %v350_v61 = vpack.c.bf16 %v349_v59, %v349_v59 }
 0x283   :  { %v705_v62 = vpop.f32.mrf.mxu0 }
 0x284   :  { %723 = vmatmul.mubr.bf16.vlgmr.msra.gmra.mxu1 %v350_v61 }
 0x344   :  { %v453_v4 = vpop.f32.mrf.mxu1 }
 0x345   :  { %v454_v5 = vadd.f32 %v612_v3, %v453_v4 }
 0x346   :  { %v724_v6 = vpop.f32.mrf.mxu1 }
 0x347   :  { %v459_v7 = vmax.f32 %v454_v5, 0.0 }
 0x348   :  { %v456_v8 = vpop.f32.mrf.mxu1 }
 0x349   :  { %v460_v9 = vadd.f32 %v459_v7, %v237_v46 }
 0x34a   :  { %v725_v10 = vpop.f32.mrf.mxu1 }
 0x34b   :  { %v461_v11 = vmax.f32 %v460_v9, 0.0 }
 0x34d   :  { %v462_v12 = vpack.c.bf16 %v461_v11, %v461_v11 }
 0x34f   :  { %743 = vmatmul.mubr.bf16.vlgmr.msra.gmra.mxu0 %v462_v12 }
 0x40f   :  { %v566_v14 = vpop.f32.mrf.mxu0 }
 0x410   :  { %v567_v15 = vadd.f32 %v621_v13, %v566_v14 }
 0x411   :  { %v744_v1 = vpop.f32.mrf.mxu0 }
 0x412   :  { %572 = vst [vmem:[#allocation8] sm:$0xff] %v567_v15 }
 0x413   :  { %v569_v16 = vpop.f32.mrf.mxu0 }
 0x414   :  { %861 = shalt.err (!%p858_p5)
}
 0x415   :  { %582 = dma.vmem_to_hbm [thread:$0]  %s580_s2, 128, %s960_s3, [#allocation4]   ;;  %v745_v17 = vpop.f32.mrf.mxu0 }
 0x416   :  { %874 = dma.done.wait [#allocation4], 128  }
 0x417   :  { %875 = vsyncadd [#allocation4], 4294967168 }
 0x418   :  { %586 = vsyncpa [#allocation3], 1 }
 0x419   :  { %587 = vsyncpa [#allocation6], 1 }
 0x41a   :  { %588 = vsyncpa [#allocation4], 1 }

</bundles_post_ra>
